<compile_context>
chip_gen: v7x
topology: tpu7x:2x2x1
jax: 0.10.0
libtpu: 0.0.40
codegen_flags: <defaults>
</compile_context>

<pallas_src>
import functools

import jax
import jax.numpy as jnp
from jax.experimental import pallas as pl
from jax.experimental.pallas import tpu as pltpu

_LANE = 128
_MAX_TILE_ROWS = 1024       # 1024x128 f32 block = 512 KiB; 2 inputs x 2 buffers = 2 MiB
_NUM_CORE_SPLITS = 2        # leading "parallel" axis (2 TensorCores on v7x)


def _masked_smooth_l1_kernel(x_ref, t_ref, sum_ref, cnt_ref, *, eps, max_disp,
                             beta, inv_2beta, half_beta, total, tile_rows,
                             blocks_per_split):
    """One (core-split, row-block) step: accumulate masked SmoothL1 sum & count.

    sum_ref / cnt_ref are (1, 1, 128) output blocks whose block index is constant
    along the row-reduction axis, so they stay resident in VMEM and serve as
    lane-shaped accumulators.  The cross-lane collapse happens once, outside.
    """
    c = pl.program_id(0)          # core split          ("parallel")
    i = pl.program_id(1)          # row-block reduction  ("arbitrary")

    @pl.when(i == 0)
    def _():
        sum_ref[...] = jnp.zeros_like(sum_ref)
        cnt_ref[...] = jnp.zeros_like(cnt_ref)

    x = x_ref[...].astype(jnp.float32)
    t = t_ref[...].astype(jnp.float32)

    diff = x - t
    adiff = jnp.abs(diff)
    # SmoothL1Loss(reduction='none'): 0.5*d^2/beta if |d| < beta else |d| - 0.5*beta
    loss = jnp.where(adiff < beta, (inv_2beta * diff) * diff, adiff - half_beta)

    # Validity mask: true (in-range) elements — handles the ragged tail block,
    # the minimal lane pad, and clamped superfluous tail steps — AND the
    # NonZeroWrapper target mask.
    blk = c * blocks_per_split + i
    row0 = blk * tile_rows
    row_ids = jax.lax.broadcasted_iota(jnp.int32, x.shape, 0)
    lane_ids = jax.lax.broadcasted_iota(jnp.int32, x.shape, 1)
    elem_idx = (row0 + row_ids) * _LANE + lane_ids
    sel = jnp.logical_and(elem_idx < total, t > eps)
    if max_disp is not None:
        sel = jnp.logical_and(sel, t <= max_disp)

    sum_ref[...] += jnp.sum(jnp.where(sel, loss, 0.0), axis=0,
                            keepdims=True).reshape(1, 1, _LANE)
    cnt_ref[...] += jnp.sum(sel.astype(jnp.float32), axis=0,
                            keepdims=True).reshape(1, 1, _LANE)


def nonzero_wrapper_loss(x, target, *, eps=0.0, max_disp=None, beta=1.0):
    """Pallas implementation of NonZeroWrapper(SmoothL1Loss(reduction='none')).forward."""
    assert x.shape == target.shape
    total = int(x.size)
    assert total < 2**31, "element-index mask uses int32"

    # Flatten (free); keep the original dtype (bf16 inputs stream as bf16,
    # cast to f32 inside the kernel).
    xf = x.reshape(-1)
    tf = target.reshape(-1)

    rem = total % _LANE
    if rem:
        # Rare: only when N*C*H*W isn't a multiple of 128.  Pad elements are
        # rejected by the in-kernel element-index mask, so the pad value is
        # irrelevant to correctness.
        pad = _LANE - rem
        xf = jnp.pad(xf, (0, pad))
        tf = jnp.pad(tf, (0, pad))

    rows = xf.size // _LANE
    xf = xf.reshape(rows, _LANE)
    tf = tf.reshape(rows, _LANE)

    # Big, sublane-aligned tile; partial tail blocks are masked in-kernel.
    if rows > _MAX_TILE_ROWS:
        tile_rows = _MAX_TILE_ROWS
    elif rows % 8 == 0 or rows < 8:
        tile_rows = rows            # block equals full row extent
    else:
        tile_rows = (rows // 8) * 8

    n_blocks = pl.cdiv(rows, tile_rows)
    n_splits = _NUM_CORE_SPLITS if n_blocks >= _NUM_CORE_SPLITS else 1
    blocks_per_split = pl.cdiv(n_blocks, n_splits)

    def in_map(c, i):
        # Clamp so superfluous tail steps never DMA out of bounds; their data
        # is fully rejected by the in-kernel element-index mask.
        return (jnp.minimum(c * blocks_per_split + i, n_blocks - 1), 0)

    kernel = functools.partial(
        _masked_smooth_l1_kernel,
        eps=float(eps),
        max_disp=None if max_disp is None else float(max_disp),
        beta=float(beta),
        inv_2beta=0.5 / float(beta),
        half_beta=0.5 * float(beta),
        total=total,
        tile_rows=int(tile_rows),
        blocks_per_split=int(blocks_per_split),
    )

    in_bytes = total * (jnp.dtype(x.dtype).itemsize + jnp.dtype(target.dtype).itemsize)
    cost = pl.CostEstimate(
        flops=10 * total,
        transcendentals=0,
        bytes_accessed=in_bytes + 2 * n_splits * _LANE * 4,
    )

    sums, cnts = pl.pallas_call(
        kernel,
        out_shape=(
            jax.ShapeDtypeStruct((n_splits, 1, _LANE), jnp.float32),
            jax.ShapeDtypeStruct((n_splits, 1, _LANE), jnp.float32),
        ),
        grid_spec=pltpu.PrefetchScalarGridSpec(
            num_scalar_prefetch=0,
            grid=(n_splits, blocks_per_split),
            in_specs=[
                pl.BlockSpec((tile_rows, _LANE), in_map),
                pl.BlockSpec((tile_rows, _LANE), in_map),
            ],
            out_specs=(
                pl.BlockSpec((1, 1, _LANE), lambda c, i: (c, 0, 0)),
                pl.BlockSpec((1, 1, _LANE), lambda c, i: (c, 0, 0)),
            ),
        ),
        compiler_params=pltpu.CompilerParams(
            dimension_semantics=("parallel", "arbitrary"),
        ),
        cost_estimate=cost,
    )(xf, tf)

    # Tiny final collapse (2 * n_splits * 128 floats) + the scalar divide.
    # count == 0 yields NaN, matching torch's mean of an empty tensor.
    return (jnp.sum(sums) / jnp.sum(cnts)).astype(jnp.float32)


def _reference(x, target, *, eps=0.0, max_disp=None, beta=1.0):
    x = x.astype(jnp.float32)
    t = target.astype(jnp.float32)
    diff = x - t
    adiff = jnp.abs(diff)
    loss = jnp.where(adiff < beta, 0.5 * diff * diff / beta, adiff - 0.5 * beta)
    mask = t > eps
    if max_disp is not None:
        mask = jnp.logical_and(mask, t <= max_disp)
    maskf = mask.astype(jnp.float32)
    return jnp.sum(loss * maskf) / jnp.sum(maskf)


def _check(x, target, **kw):
    out = jax.block_until_ready(nonzero_wrapper_loss(x, target, **kw))
    ref = jax.block_until_ready(_reference(x, target, **kw))
    assert jnp.allclose(out, ref, rtol=1e-4, atol=1e-5), (kw, out, ref)


if __name__ == "__main__":
    key = jax.random.PRNGKey(0)
    kx, kt, kx2, kt2, kx3, kt3 = jax.random.split(key, 6)

    # Primary small NCHW case, as the forward implies (dense disparity maps).
    B, C, H, W = 2, 4, 16, 16
    x = jax.random.normal(kx, (B, C, H, W), dtype=jnp.float32) * 2.0 + 1.0
    target = jax.random.normal(kt, (B, C, H, W), dtype=jnp.float32) * 3.0 + 1.0

    _check(x, target, eps=0.0, max_disp=None)
    _check(x, target, eps=0.0, max_disp=4.0)

    # Larger map: exercises multi-block grid, 2-way core split, partial tail block.
    x2 = jax.random.normal(kx2, (1, 1, 320, 960), dtype=jnp.float32) * 2.0 + 1.0
    t2 = jax.random.normal(kt2, (1, 1, 320, 960), dtype=jnp.float32) * 3.0 + 1.0
    _check(x2, t2, eps=0.0, max_disp=None)

    # Non-multiple-of-128 element count: exercises the lane-pad + tail-mask path.
    x3 = jax.random.normal(kx3, (2, 1, 13, 17), dtype=jnp.float32) * 2.0 + 1.0
    t3 = jax.random.normal(kt3, (2, 1, 13, 17), dtype=jnp.float32) * 3.0 + 1.0
    _check(x3, t3, eps=0.0, max_disp=4.0)

    print("KERNEL_OK")
</pallas_src>

<mosaic_0001>
module attributes {stable_mosaic.version = 11 : i64} {
  func.func @_masked_smooth_l1_kernel(%arg0: i32, %arg1: i32, %arg2: memref<16x128xf32, #tpu.memory_space<vmem>>, %arg3: memref<16x128xf32, #tpu.memory_space<vmem>>, %arg4: memref<1x1x128xf32, #tpu.memory_space<vmem>>, %arg5: memref<1x1x128xf32, #tpu.memory_space<vmem>>) attributes {dimension_semantics = [#tpu.dimension_semantics<parallel>, #tpu.dimension_semantics<arbitrary>], iteration_bounds = array<i64: 1, 1>, scalar_prefetch = 0 : i64, scratch_operands = 0 : i64, tpu.core_type = #tpu.core_type<tc>, window_params = [{transform_indices = @transform_0, window_bounds = array<i64: 16, 128>}, {transform_indices = @transform_1, window_bounds = array<i64: 16, 128>}, {transform_indices = @transform_2, window_bounds = array<i64: 1, 1, 128>}, {transform_indices = @transform_3, window_bounds = array<i64: 1, 1, 128>}]} {
    %c0_i32 = arith.constant 0 : i32
    %0 = arith.cmpi eq, %arg1, %c0_i32 : i32
    %1 = arith.extui %0 : i1 to i32
    %c0_i32_0 = arith.constant 0 : i32
    %2 = arith.cmpi ne, %1, %c0_i32_0 : i32
    scf.if %2 {
      %cst_22 = arith.constant 0.000000e+00 : f32
      %46 = vector.broadcast %cst_22 : f32 to vector<1x1x128xf32>
      %c0_23 = arith.constant 0 : index
      %c0_24 = arith.constant 0 : index
      %c0_25 = arith.constant 0 : index
      %47 = vector.load %arg4[%c0_23, %c0_24, %c0_25] : memref<1x1x128xf32, #tpu.memory_space<vmem>>, vector<1x1x128xf32>
      tpu.vector_store %arg4[%c0_23, %c0_24, %c0_25], %46 {strides = array<i32>} : memref<1x1x128xf32, #tpu.memory_space<vmem>>, vector<1x1x128xf32>,
      %cst_26 = arith.constant 0.000000e+00 : f32
      %48 = vector.broadcast %cst_26 : f32 to vector<1x1x128xf32>
      %c0_27 = arith.constant 0 : index
      %c0_28 = arith.constant 0 : index
      %c0_29 = arith.constant 0 : index
      %49 = vector.load %arg5[%c0_27, %c0_28, %c0_29] : memref<1x1x128xf32, #tpu.memory_space<vmem>>, vector<1x1x128xf32>
      tpu.vector_store %arg5[%c0_27, %c0_28, %c0_29], %48 {strides = array<i32>} : memref<1x1x128xf32, #tpu.memory_space<vmem>>, vector<1x1x128xf32>,
    } else {
    }
    %c0 = arith.constant 0 : index
    %c0_1 = arith.constant 0 : index
    %3 = vector.load %arg2[%c0, %c0_1] : memref<16x128xf32, #tpu.memory_space<vmem>>, vector<16x128xf32>
    %c0_2 = arith.constant 0 : index
    %c0_3 = arith.constant 0 : index
    %4 = vector.load %arg3[%c0_2, %c0_3] : memref<16x128xf32, #tpu.memory_space<vmem>>, vector<16x128xf32>
    %5 = arith.subf %3, %4 : vector<16x128xf32>
    %6 = math.absf %5 : vector<16x128xf32>
    %cst = arith.constant 1.000000e+00 : f32
    %7 = vector.broadcast %cst : f32 to vector<16x128xf32>
    %8 = arith.cmpf olt, %6, %7 : vector<16x128xf32>
    %cst_4 = arith.constant 5.000000e-01 : f32
    %9 = vector.broadcast %cst_4 : f32 to vector<16x128xf32>
    %10 = arith.mulf %9, %5 : vector<16x128xf32>
    %11 = arith.mulf %10, %5 : vector<16x128xf32>
    %cst_5 = arith.constant 5.000000e-01 : f32
    %12 = vector.broadcast %cst_5 : f32 to vector<16x128xf32>
    %13 = arith.subf %6, %12 : vector<16x128xf32>
    %14 = arith.select %8, %11, %13 : vector<16x128xi1>, vector<16x128xf32>
    %c1_i32 = arith.constant 1 : i32
    %15 = arith.muli %arg0, %c1_i32 : i32
    %16 = arith.addi %15, %arg1 : i32
    %c16_i32 = arith.constant 16 : i32
    %17 = arith.muli %16, %c16_i32 : i32
    %18 = tpu.iota {dimensions = array<i32: 0>} : vector<16x128xi32>
    %19 = tpu.iota {dimensions = array<i32: 1>} : vector<16x128xi32>
    %20 = vector.broadcast %17 : i32 to vector<16x128xi32>
    %21 = arith.addi %20, %18 : vector<16x128xi32>
    %c128_i32 = arith.constant 128 : i32
    %22 = vector.broadcast %c128_i32 : i32 to vector<16x128xi32>
    %23 = arith.muli %21, %22 : vector<16x128xi32>
    %24 = arith.addi %23, %19 : vector<16x128xi32>
    %c2048_i32 = arith.constant 2048 : i32
    %25 = vector.broadcast %c2048_i32 : i32 to vector<16x128xi32>
    %26 = arith.cmpi slt, %24, %25 : vector<16x128xi32>
    %cst_6 = arith.constant 0.000000e+00 : f32
    %27 = vector.broadcast %cst_6 : f32 to vector<16x128xf32>
    %28 = arith.cmpf ogt, %4, %27 : vector<16x128xf32>
    %29 = arith.andi %26, %28 : vector<16x128xi1>
    %c0_7 = arith.constant 0 : index
    %c0_8 = arith.constant 0 : index
    %c0_9 = arith.constant 0 : index
    %30 = vector.load %arg4[%c0_7, %c0_8, %c0_9] : memref<1x1x128xf32, #tpu.memory_space<vmem>>, vector<1x1x128xf32>
    %cst_10 = arith.constant 0.000000e+00 : f32
    %31 = vector.broadcast %cst_10 : f32 to vector<16x128xf32>
    %32 = arith.select %29, %14, %31 : vector<16x128xi1>, vector<16x128xf32>
    %cst_11 = arith.constant dense<0.000000e+00> : vector<128xf32>
    %33 = vector.multi_reduction <add>, %32, %cst_11 [0] : vector<16x128xf32> to vector<128xf32>
    %34 = vector.shape_cast %33 : vector<128xf32> to vector<1x128xf32>
    %35 = vector.shape_cast %34 : vector<1x128xf32> to vector<1x1x128xf32>
    %36 = arith.addf %30, %35 : vector<1x1x128xf32>
    %c0_12 = arith.constant 0 : index
    %c0_13 = arith.constant 0 : index
    %c0_14 = arith.constant 0 : index
    %37 = vector.load %arg4[%c0_12, %c0_13, %c0_14] : memref<1x1x128xf32, #tpu.memory_space<vmem>>, vector<1x1x128xf32>
    tpu.vector_store %arg4[%c0_12, %c0_13, %c0_14], %36 {strides = array<i32>} : memref<1x1x128xf32, #tpu.memory_space<vmem>>, vector<1x1x128xf32>,
    %c0_15 = arith.constant 0 : index
    %c0_16 = arith.constant 0 : index
    %c0_17 = arith.constant 0 : index
    %38 = vector.load %arg5[%c0_15, %c0_16, %c0_17] : memref<1x1x128xf32, #tpu.memory_space<vmem>>, vector<1x1x128xf32>
    %39 = arith.extui %29 : vector<16x128xi1> to vector<16x128xi32>
    %40 = arith.sitofp %39 : vector<16x128xi32> to vector<16x128xf32>
    %cst_18 = arith.constant dense<0.000000e+00> : vector<128xf32>
    %41 = vector.multi_reduction <add>, %40, %cst_18 [0] : vector<16x128xf32> to vector<128xf32>
    %42 = vector.shape_cast %41 : vector<128xf32> to vector<1x128xf32>
    %43 = vector.shape_cast %42 : vector<1x128xf32> to vector<1x1x128xf32>
    %44 = arith.addf %38, %43 : vector<1x1x128xf32>
    %c0_19 = arith.constant 0 : index
    %c0_20 = arith.constant 0 : index
    %c0_21 = arith.constant 0 : index
    %45 = vector.load %arg5[%c0_19, %c0_20, %c0_21] : memref<1x1x128xf32, #tpu.memory_space<vmem>>, vector<1x1x128xf32>
    tpu.vector_store %arg5[%c0_19, %c0_20, %c0_21], %44 {strides = array<i32>} : memref<1x1x128xf32, #tpu.memory_space<vmem>>, vector<1x1x128xf32>,
    return
  }
  func.func @transform_0(%arg0: i32, %arg1: i32) -> (i32, i32) {
    %c1_i32 = arith.constant 1 : i32
    %0 = arith.muli %arg0, %c1_i32 : i32
    %1 = arith.addi %0, %arg1 : i32
    %c0_i32 = arith.constant 0 : i32
    %2 = arith.minsi %1, %c0_i32 : i32
    %c0_i32_0 = arith.constant 0 : i32
    %c0_i32_1 = arith.constant 0 : i32
    return %2, %c0_i32_0 : i32, i32
  }
  func.func @transform_1(%arg0: i32, %arg1: i32) -> (i32, i32) {
    %c1_i32 = arith.constant 1 : i32
    %0 = arith.muli %arg0, %c1_i32 : i32
    %1 = arith.addi %0, %arg1 : i32
    %c0_i32 = arith.constant 0 : i32
    %2 = arith.minsi %1, %c0_i32 : i32
    %c0_i32_0 = arith.constant 0 : i32
    %c0_i32_1 = arith.constant 0 : i32
    return %2, %c0_i32_0 : i32, i32
  }
  func.func @transform_2(%arg0: i32, %arg1: i32) -> (i32, i32, i32) {
    %c0_i32 = arith.constant 0 : i32
    %c0_i32_0 = arith.constant 0 : i32
    %c0_i32_1 = arith.constant 0 : i32
    return %arg0, %c0_i32, %c0_i32_0 : i32, i32, i32
  }
  func.func @transform_3(%arg0: i32, %arg1: i32) -> (i32, i32, i32) {
    %c0_i32 = arith.constant 0 : i32
    %c0_i32_0 = arith.constant 0 : i32
    %c0_i32_1 = arith.constant 0 : i32
    return %arg0, %c0_i32, %c0_i32_0 : i32, i32, i32
  }
}

</mosaic_0001>

<bundles_post_ra>
// kernel: tpu_custom_call.1
= control target key start
LH: loop header
LB: loop body
LE: loop exit
PB: predicated region body
PF: predicated region fallthrough
CT: control target
= control target key end

     0   :  { %9 = vsyncpa [#allocation3], 0  ;;  %s357_s0 = inlined_call_operand.hbm [shape: f32[16,128], index: 0, kind: input, shape index: {}]   ;;  %s358_s1 = inlined_call_operand.hbm [shape: f32[16,128], index: 1, kind: input, shape index: {}]   ;;  %s359_s2 = inlined_call_operand.hbm [shape: f32[1,1,128], index: 2, kind: output, shape index: {0}]   ;;  %s360_s3 = inlined_call_operand.hbm [shape: f32[1,1,128], index: 3, kind: output, shape index: {1}]  }
   0x1   :  { %10 = vsyncpa [#allocation6], 0 }
   0x2   :  { %11 = vsyncpa [#allocation4], 0 }
   0x3   :  { %12 = vsyncpa [#allocation9], 0  ;;  %s274_s12 = smov [#allocation2]   ;;  %s178_s16 = scalar_lea.hbm %s357_s0, 256 }
   0x4   :  { %s24_s13 = sshll.u32 %s274_s12, 4  ;;  %p179_p0 = scmp.ne.s32.totalorder %s357_s0, %s178_s16  ;;  %s25_s13 = int_to_ptr.vmem [resolvable:$true] %s24_s13 }
   0x5   :  { %p182_p1 = scmp.lt.u32.totalorder %s178_s16, %s357_s0 }
   0x7   :  { %p184_p2 = pnand %p182_p1, %p179_p0 }
   0x9   :  { %187 = shalt.err (!%p184_p2)
}
   0xa   :  { %s188_s21 = scalar_lea.vmem %s25_s13, 256  ;;  %p193_p4 = scmp.lt.s32.totalorder %s25_s13, %s25_s13 }
   0xb   :  { %p189_p3 = scmp.ne.s32.totalorder %s25_s13, %s188_s21  ;;  %p194_p5 = scmp.lt.s32.totalorder %s188_s21, %s188_s21 }
   0xd   :  { %p195_p6 = por %p194_p5, %p193_p4 }
   0xf   :  { %p196_p7 = pnand %p195_p6, %p189_p3 }
  0x11   :  { %199 = shalt.err (!%p196_p7)
}
  0x12   :  { %s275_s22 = smov 128   ;;  %s276_s23 = smov 8  }
  0x13   :  { %30 = dma.hbm_to_vmem [thread:$0]  %s357_s0, 256, %s25_s13, [#allocation3], %s275_s22, %s275_s22, %s276_s23  }
  0x14   :  { %s277_s26 = smov [#allocation5]   ;;  %s200_s30 = scalar_lea.hbm %s358_s1, 256 }
  0x15   :  { %s42_s27 = sshll.u32 %s277_s26, 4  ;;  %p201_p8 = scmp.ne.s32.totalorder %s358_s1, %s200_s30  ;;  %s43_s27 = int_to_ptr.vmem [resolvable:$true] %s42_s27 }
  0x16   :  { %p204_p9 = scmp.lt.u32.totalorder %s200_s30, %s358_s1 }
  0x18   :  { %p206_p10 = pnand %p204_p9, %p201_p8 }
  0x1a   :  { %209 = shalt.err (!%p206_p10)
}
  0x1b   :  { %s210_s8 = scalar_lea.vmem %s43_s27, 256  ;;  %p215_p12 = scmp.lt.s32.totalorder %s43_s27, %s43_s27 }
  0x1c   :  { %p211_p11 = scmp.ne.s32.totalorder %s43_s27, %s210_s8  ;;  %p216_p13 = scmp.lt.s32.totalorder %s210_s8, %s210_s8 }
  0x1e   :  { %p217_p0 = por %p216_p13, %p215_p12 }
  0x20   :  { %p218_p1 = pnand %p217_p0, %p211_p11 }
  0x22   :  { %221 = shalt.err (!%p218_p1)
}
  0x23   :  { %48 = dma.hbm_to_vmem [thread:$0]  %s358_s1, 256, %s43_s27, [#allocation6], %s275_s22, %s275_s22, %s276_s23  }
  0x24   :  { %266 = dma.done.wait [#allocation3], 256  }
  0x25   :  { %267 = vsyncadd [#allocation3], 4294967040 }
  0x26   :  { %268 = dma.done.wait [#allocation6], 256  }
  0x27   :  { %269 = vsyncadd [#allocation6], 4294967040  ;;  %v89_v0 = vlaneseq  ;;  %v278_v1 = vmov 0.0   ;;  %v69_v8 = vld [vmem:[#allocation2] sm:$0xff]  ;;  %v70_v9 = vld [vmem:[#allocation2 + $0x8] sm:$0xff]  ;;  %s279_s1 = smov [#allocation8]  }
  0x28   :  { %67 = vst [vmem:[#allocation7] sm:$0x1] %v278_v1  ;;  %68 = vst [vmem:[#allocation8] sm:$0x1] %v278_v1  ;;  %v71_v10 = vld [vmem:[#allocation5] sm:$0xff]  ;;  %v72_v11 = vld [vmem:[#allocation5 + $0x8] sm:$0xff] }
  0x29   :  { %v90_v2 = vshrl.u32 %v89_v0, 7  ;;  %v93_v3 = vand.u32 127, %v89_v0  ;;  %v73_v12 = vsub.f32 %v69_v8, %v71_v10  ;;  %vm103_vm1 = vcmp.gt.f32.partialorder %v71_v10, 0.0  ;;  %s149_s10 = sshll.u32 %s279_s1, 4  ;;  %s280_s11 = smov [#allocation7]   ;;  %s150_s10 = int_to_ptr.vmem [resolvable:$true] %s149_s10 }
  0x2a   :  { %v74_v14 = vsub.f32 %v70_v9, %v72_v11  ;;  %vm104_vm2 = vcmp.gt.f32.partialorder %v72_v11, 0.0  ;;  %s139_s12 = sshll.u32 %s280_s11, 4  ;;  %s222_s13 = scalar_lea.vmem %s150_s10, 16  ;;  %s140_s12 = int_to_ptr.vmem [resolvable:$true] %s139_s12 }
  0x2b   :  { %v91_v4 = vadd.s32 8, %v90_v2  ;;  %v97_v5 = vmul.u32 128, %v90_v2  ;;  %v75_v16 = vand.u32 2147483647, %v73_v12  ;;  %v79_v17 = vmul.f32 0.5, %v73_v12  ;;  %p223_p2 = scmp.ne.s32.totalorder %s150_s10, %s222_s13  ;;  %s226_s14 = scalar_lea.vmem %s150_s10, 32 }
  0x2c   :  { %v76_v19 = vand.u32 2147483647, %v74_v14  ;;  %v80_v20 = vmul.f32 0.5, %v74_v14  ;;  %p227_p3 = scmp.lt.s32.totalorder %s150_s10, %s150_s10  ;;  %p228_p4 = scmp.lt.s32.totalorder %s226_s14, %s222_s13 }
  0x2d   :  { %v98_v6 = vmul.u32 128, %v91_v4  ;;  %v99_v7 = vadd.s32 %v97_v5, %v93_v3  ;;  %vm77_vm6 = vcmp.lt.f32.partialorder %v75_v16, 1.0  ;;  %v81_v21 = vmul.f32 %v79_v17, %v73_v12 }
  0x2e   :  { %v167_v22 = vadd.f32 -0.5, %v75_v16  ;;  %vm78_vm7 = vcmp.lt.f32.partialorder %v76_v19, 1.0  ;;  %v82_v24 = vmul.f32 %v80_v20, %v74_v14  ;;  %v168_v25 = vadd.f32 -0.5, %v76_v19  ;;  %p229_p5 = por %p228_p4, %p227_p3 }
  0x2f   :  { %v100_v13 = vadd.s32 %v98_v6, %v93_v3  ;;  %vm101_vm0 = vcmp.lt.s32.totalorder %v99_v7, 2048  ;;  %v119_v40 = vld [vmem:[#allocation8] sm:$0x1]  ;;  %v107_v45 = vld [vmem:[#allocation7] sm:$0x1] }
  0x30   :  { %vm325_vm3 = vmand %vm101_vm0, %vm103_vm1  ;;  %v85_v27 = vsel %vm77_vm6, %v81_v21, %v167_v22  ;;  %v86_v28 = vsel %vm78_vm7, %v82_v24, %v168_v25  ;;  %p230_p6 = pnand %p229_p5, %p223_p2 }
  0x31   :  { %vm102_vm4 = vcmp.lt.s32.totalorder %v100_v13, 2048  ;;  %v169_v18 = vsel %vm325_vm3, 1.0, %v278_v1  ;;  %v108_v29 = vsel %vm325_vm3, %v85_v27, 0.0 }
  0x32   :  { %vm106_vm5 = vmand %vm102_vm4, %vm104_vm2 }
  0x33   :  { %v170_v23 = vsel %vm106_vm5, 1.0, %v278_v1  ;;  %v109_v31 = vsel %vm106_vm5, %v86_v28, 0.0 }
  0x34   :  { %v124_v26 = vadd.f32 %v170_v23, %v169_v18  ;;  %v110_v32 = vadd.f32 %v109_v31, %v108_v29 }
  0x36   :  { %v125_v30 = vrot.slane %v124_v26, 4  ;;  %v111_v34 = vrot.slane %v110_v32, 4 }
  0x38   :  { %v126_v33 = vadd.f32 %v125_v30, %v124_v26  ;;  %v112_v36 = vadd.f32 %v111_v34, %v110_v32 }
  0x3a   :  { %v127_v35 = vrot.slane %v126_v33, 2  ;;  %v113_v38 = vrot.slane %v112_v36, 2 }
  0x3c   :  { %v128_v37 = vadd.f32 %v127_v35, %v126_v33  ;;  %v114_v41 = vadd.f32 %v113_v38, %v112_v36 }
  0x3e   :  { %v129_v39 = vrot.slane %v128_v37, 1  ;;  %v115_v43 = vrot.slane %v114_v41, 1 }
  0x40   :  { %v130_v42 = vadd.f32 %v129_v39, %v128_v37  ;;  %v116_v46 = vadd.f32 %v115_v43, %v114_v41 }
  0x42   :  { %v131_v44 = vadd.f32 %v130_v42, %v119_v40 }
  0x44   :  { %132 = vst [vmem:[#allocation8] sm:$0x1] %v131_v44 }
  0x45   :  { %233 = shalt.err (!%p230_p6)
}
  0x46   :  { %s234_s17 = scalar_lea.hbm %s360_s3, 16 }
  0x47   :  { %p235_p7 = scmp.ne.s32.totalorder %s360_s3, %s234_s17  ;;  %p238_p8 = scmp.lt.u32.totalorder %s234_s17, %s360_s3 }
  0x49   :  { %p240_p9 = pnand %p238_p8, %p235_p7 }
  0x4b   :  { %243 = shalt.err (!%p240_p9)
}
  0x4c   :  { %152 = dma.vmem_to_hbm [thread:$0]  %s150_s10, 16, %s360_s3, [#allocation9]   ;;  %v117_v47 = vadd.f32 %v116_v46, %v107_v45 }
  0x4d   :  { %s244_s24 = scalar_lea.vmem %s140_s12, 16  ;;  %s248_s25 = scalar_lea.vmem %s140_s12, 32 }
  0x4e   :  { %118 = vst [vmem:[#allocation7] sm:$0x1] %v117_v47  ;;  %p245_p10 = scmp.ne.s32.totalorder %s140_s12, %s244_s24  ;;  %p249_p11 = scmp.lt.s32.totalorder %s140_s12, %s140_s12 }
  0x4f   :  { %p250_p12 = scmp.lt.s32.totalorder %s248_s25, %s244_s24 }
  0x51   :  { %p251_p13 = por %p250_p12, %p249_p11 }
  0x53   :  { %p252_p0 = pnand %p251_p13, %p245_p10 }
  0x55   :  { %255 = shalt.err (!%p252_p0)
}
  0x56   :  { %s256_s28 = scalar_lea.hbm %s359_s2, 16 }
  0x57   :  { %p257_p1 = scmp.ne.s32.totalorder %s359_s2, %s256_s28  ;;  %p260_p2 = scmp.lt.u32.totalorder %s256_s28, %s359_s2 }
  0x59   :  { %p262_p3 = pnand %p260_p2, %p257_p1 }
  0x5b   :  { %265 = shalt.err (!%p262_p3)
}
  0x5c   :  { %142 = dma.vmem_to_hbm [thread:$0]  %s140_s12, 16, %s359_s2, [#allocation4]  }
  0x5d   :  { %270 = dma.done.wait [#allocation4], 16  }
  0x5e   :  { %271 = vsyncadd [#allocation4], 4294967280 }
  0x5f   :  { %272 = dma.done.wait [#allocation9], 16  }
  0x60   :  { %273 = vsyncadd [#allocation9], 4294967280 }
  0x61   :  { %159 = vsyncpa [#allocation3], 1 }
  0x62   :  { %160 = vsyncpa [#allocation6], 1 }
  0x63   :  { %161 = vsyncpa [#allocation4], 1 }
  0x64   :  { %162 = vsyncpa [#allocation9], 1 }

</bundles_post_ra>
